<compile_context>
chip_gen: v7x
topology: tpu7x:2x2x1
jax: 0.10.0
libtpu: 0.0.40
codegen_flags: <defaults>
</compile_context>

<pallas_src>
from functools import partial

import jax
import jax.numpy as jnp
from jax.experimental import pallas as pl
from jax.experimental.pallas import tpu as pltpu

F_IN = 4        # 1 atomic number + 3 position coords
HID = 32        # expert hidden dim           -> E*HID = 128 (one full lane width)
HID_G = 16      # gating hidden dim           -> E*HID + HID_G = 144
D_OUT = 8       # expert output dim per graph -> E*D   = 32
N_EXPERTS = 4

# Row layout of the packed small-constants buffer (shape [CONST_ROWS, E*D + HID_G]).
ROW_B2 = 0                               # [1, E*D+HID_G]  expert b2 | zeros
ROW_BG2 = 1                              # [1, E]          gating bias 2
ROW_WG2 = 8                              # [HID_G, E]      gating weight 2
ROW_EXPAND = ROW_WG2 + HID_G             # [E, E*D]        expand one-hot (E <= 8 assumed)
ROW_COLLAPSE = ROW_EXPAND + 8            # [E*D, D]        collapse one-hot
CONST_ROWS = ROW_COLLAPSE + N_EXPERTS * D_OUT


# ----------------------------- fused Pallas kernel --------------------------

def moe_fused_kernel(batch_ref, an_ref, pos_ref, w1_ref, w2_ref, c_ref,
                     out_ref, acc_ref, cnt_ref, *, n_total):
    """Fused MoE forward over one node chunk; pooled sums accumulate in VMEM scratch."""
    i = pl.program_id(0)
    tn = pos_ref.shape[0]
    b = out_ref.shape[0]
    d = out_ref.shape[1]
    ed = N_EXPERTS * d

    @pl.when(i == 0)
    def _init():
        acc_ref[...] = jnp.zeros_like(acc_ref)
        cnt_ref[...] = jnp.zeros_like(cnt_ref)

    an = an_ref[...]                                                       # [TN, 1]
    pos = pos_ref[...]                                                     # [TN, 3]
    seg_eq = (batch_ref[...] ==
              jax.lax.broadcasted_iota(jnp.int32, (b, tn), 0))             # [B, TN]

    if n_total % tn != 0:  # static: mask only needed when a ragged tail chunk exists
        start = i * tn
        valid_row = (jax.lax.broadcasted_iota(jnp.int32, (tn, 1), 0) + start) < n_total
        valid_col = (jax.lax.broadcasted_iota(jnp.int32, (1, tn), 1) + start) < n_total
        an = jnp.where(valid_row, an, 0.0)
        pos = jnp.where(valid_row, pos, 0.0)
        seg_eq = seg_eq & valid_col
    segT = seg_eq.astype(jnp.float32)                                      # [B, TN]

    # ---- fused expert + gating layer 1: one MXU matmul (pos) + broadcast mul (atomic nr) ----
    w_an = w1_ref[0:1, :]                                                  # [1, 144]
    w_pos = w1_ref[1:4, :]                                                 # [3, 144]
    b1 = w1_ref[4:5, :]                                                    # [1, 144]
    hcat = jnp.maximum(
        jnp.dot(pos, w_pos, preferred_element_type=jnp.float32) + an * w_an + b1,
        0.0)                                                               # [TN, 144]

    # ---- fused layer 2: block-diag expert W2 + identity passthrough of gating hidden ----
    b2ext = c_ref[ROW_B2:ROW_B2 + 1, :]                                    # [1, 48]
    ycat = jnp.dot(hcat, w2_ref[...],
                   preferred_element_type=jnp.float32) + b2ext             # [TN, E*D+HID_G]

    # ---- per-graph pooling: ONE one-hot segment matmul pools experts and gating together ----
    acc_ref[...] += jnp.dot(segT, ycat, preferred_element_type=jnp.float32)   # [B, E*D+HID_G]
    cnt_ref[...] += jnp.sum(segT, axis=1, keepdims=True)                      # [B, 1]

    @pl.when(i == pl.num_programs(0) - 1)
    def _finalize():
        pooled_cat = acc_ref[...]                                          # [B, E*D+HID_G]
        # Guarded reciprocal: empty graphs give 0 instead of NaN (deliberate divergence).
        inv_counts = pl.reciprocal(jnp.maximum(cnt_ref[...], 1.0))         # [B, 1]
        expert_pooled = pooled_cat[:, :ed]                                 # [B, E*D] sum pool
        gate_pooled = pooled_cat[:, ed:ed + HID_G] * inv_counts            # [B, HID_G] mean pool

        # gating head + softmax
        wg2 = c_ref[ROW_WG2:ROW_WG2 + HID_G, 0:N_EXPERTS]                  # [HID_G, E]
        bg2 = c_ref[ROW_BG2:ROW_BG2 + 1, 0:N_EXPERTS]                      # [1, E]
        logits = jnp.dot(gate_pooled, wg2,
                         preferred_element_type=jnp.float32) + bg2         # [B, E]
        m = jnp.max(logits, axis=-1, keepdims=True)
        ex = jnp.exp(logits - m)
        denom = jnp.sum(ex, axis=-1, keepdims=True)
        r = pl.reciprocal(denom, approx=True)        # EUP slot (free)
        r = r * (2.0 - denom * r)                    # one Newton step -> full f32 accuracy
        wts = ex * r                                 # softmax weights [B, E]

        # weighted combine over experts, lane-packed, via pre-built one-hot matmuls
        expand = c_ref[ROW_EXPAND:ROW_EXPAND + N_EXPERTS, 0:ed]            # [E, E*D]
        collapse = c_ref[ROW_COLLAPSE:ROW_COLLAPSE + ed, 0:d]              # [E*D, D]
        w_packed = jnp.dot(wts, expand, preferred_element_type=jnp.float32)  # [B, E*D]
        out_ref[...] = jnp.dot(expert_pooled * w_packed, collapse,
                               preferred_element_type=jnp.float32)         # [B, D]


# ----------------------------- one-time weight packing -----------------------

def pack_moe_params(params):
    """Pack per-expert + gating weights into 3 lane-dense fused buffers (done once)."""
    e, f, h = params["w1"].shape           # E, F, HID
    d = params["w2"].shape[2]              # D
    hg = params["wg1"].shape[1]            # HID_G
    eh, ed = e * h, e * d

    # Fused layer-1 weight: lanes 0:EH = experts, EH:EH+HG = gating; row 4 = biases.
    w1_cat = jnp.transpose(params["w1"], (1, 0, 2)).reshape(f, eh)          # [F, E*HID]
    b1_cat = params["b1"].reshape(1, eh)                                    # [1, E*HID]
    w1g1 = jnp.concatenate(
        [jnp.concatenate([w1_cat, params["wg1"]], axis=1),                  # [F, EH+HG]
         jnp.concatenate([b1_cat, params["bg1"]], axis=1)], axis=0)         # [F+1, EH+HG]

    # Fused layer-2: block-diagonal expert W2 (top-left) + identity passthrough (bottom-right).
    eye_e = jnp.eye(e, dtype=jnp.float32)
    w2_bd = jnp.einsum("ehd,ef->ehfd", params["w2"], eye_e).reshape(eh, ed)  # [E*HID, E*D]
    w2ext = jnp.zeros((eh + hg, ed + hg), jnp.float32)
    w2ext = w2ext.at[:eh, :ed].set(w2_bd)
    w2ext = w2ext.at[eh:, ed:].set(jnp.eye(hg, dtype=jnp.float32))           # [144, 48]

    # Small constants packed into ONE buffer (one DMA descriptor instead of five).
    b2ext = jnp.concatenate([params["b2"].reshape(1, ed),
                             jnp.zeros((1, hg), jnp.float32)], axis=1)       # [1, E*D+HG]
    expand = jnp.repeat(jnp.eye(e, dtype=jnp.float32), d, axis=1)            # [E, E*D]
    collapse = jnp.tile(jnp.eye(d, dtype=jnp.float32), (e, 1))               # [E*D, D]
    consts = jnp.zeros((CONST_ROWS, ed + hg), jnp.float32)
    consts = consts.at[ROW_B2:ROW_B2 + 1, :].set(b2ext)
    consts = consts.at[ROW_BG2:ROW_BG2 + 1, 0:e].set(params["bg2"].reshape(1, e))
    consts = consts.at[ROW_WG2:ROW_WG2 + hg, 0:e].set(params["wg2"])
    consts = consts.at[ROW_EXPAND:ROW_EXPAND + e, 0:ed].set(expand)
    consts = consts.at[ROW_COLLAPSE:ROW_COLLAPSE + ed, 0:d].set(collapse)

    return {"w1g1": w1g1, "w2ext": w2ext, "consts": consts}


# ----------------------------- wrapper ---------------------------------------

@partial(jax.jit, static_argnums=(4,))
def moe_forward(atomic_numbers, pos, edge_index, batch, num_graphs, packed):
    del edge_index  # TODO(synk): gating GNN message passing over edges not implemented
    n = pos.shape[0]
    # Reshape-only wrapper: no concatenate / HBM intermediate per call.
    an = atomic_numbers.astype(jnp.float32).reshape(n, 1)        # [N, 1]
    pos = pos.astype(jnp.float32)                                # [N, 3]
    batch_row = batch.astype(jnp.int32).reshape(1, n)            # [1, N]

    e, d, hg = N_EXPERTS, D_OUT, HID_G
    ehhg = e * HID + hg                                          # 144
    edhg = e * d + hg                                            # 48

    # Node-chunk tile: full array for small N, else a 128-multiple chunk.
    # TODO(synk): halve the cap on v7x (64 MiB VMEM) and add a 'parallel' graph axis there.
    tn = n if n <= 1024 else 1024
    grid = (pl.cdiv(n, tn),)

    return pl.pallas_call(
        partial(moe_fused_kernel, n_total=n),
        out_shape=jax.ShapeDtypeStruct((num_graphs, d), jnp.float32),
        grid_spec=pltpu.PrefetchScalarGridSpec(
            num_scalar_prefetch=0,
            grid=grid,
            in_specs=[
                pl.BlockSpec((1, tn), lambda i: (0, i)),         # batch ids (node chunk)
                pl.BlockSpec((tn, 1), lambda i: (i, 0)),         # atomic numbers
                pl.BlockSpec((tn, 3), lambda i: (i, 0)),         # positions
                pl.BlockSpec((F_IN + 1, ehhg), lambda i: (0, 0)),   # fused layer-1 weights (+bias row)
                pl.BlockSpec((ehhg, edhg), lambda i: (0, 0)),       # fused layer-2 weights
                pl.BlockSpec((CONST_ROWS, edhg), lambda i: (0, 0)), # packed small constants
            ],
            out_specs=pl.BlockSpec((num_graphs, d), lambda i: (0, 0)),
            scratch_shapes=[pltpu.VMEM((num_graphs, edhg), jnp.float32),  # pooled-sum accumulator
                            pltpu.VMEM((num_graphs, 1), jnp.float32)],   # node-count accumulator
        ),
        compiler_params=pltpu.CompilerParams(
            dimension_semantics=("arbitrary",)),
    )(batch_row, an, pos, packed["w1g1"], packed["w2ext"], packed["consts"])


# Pure-JAX reference mirroring the PyTorch forward exactly.
def moe_forward_ref(atomic_numbers, pos, edge_index, batch, num_graphs, params):
    del edge_index
    x = jnp.concatenate([atomic_numbers[:, None], pos], axis=-1).astype(jnp.float32)
    expert_graph = []
    for e in range(params["w1"].shape[0]):
        h = jnp.maximum(x @ params["w1"][e] + params["b1"][e], 0.0)
        y = h @ params["w2"][e] + params["b2"][e]
        expert_graph.append(jax.ops.segment_sum(y, batch, num_segments=num_graphs))
    expert_outputs = jnp.stack(expert_graph, axis=2)                      # [B, D, E]
    node_g = jnp.maximum(x @ params["wg1"] + params["bg1"], 0.0)
    counts = jax.ops.segment_sum(jnp.ones((x.shape[0],), jnp.float32),
                                 batch, num_segments=num_graphs)
    pooled = jax.ops.segment_sum(node_g, batch,
                                 num_segments=num_graphs) / counts[:, None]
    logits = pooled @ params["wg2"] + params["bg2"]
    weights = jax.nn.softmax(logits, axis=-1)                             # [B, E]
    weights = weights[:, None, :]                                         # unsqueeze(1) + expand
    return jnp.sum(expert_outputs * weights, axis=2)                      # [B, D]


# ----------------------------- main -----------------------------------------

if __name__ == "__main__":
    key = jax.random.PRNGKey(0)
    keys = jax.random.split(key, 12)

    N_NODES = 16     # total nodes across all graphs
    N_GRAPHS = 2     # batch of graphs
    N_EDGES = 32

    atomic_numbers = jax.random.randint(keys[0], (N_NODES,), 1, 10).astype(jnp.float32)
    pos = jax.random.normal(keys[1], (N_NODES, 3), jnp.float32)
    batch = jnp.repeat(jnp.arange(N_GRAPHS, dtype=jnp.int32), N_NODES // N_GRAPHS)
    edge_index = jax.random.randint(keys[2], (2, N_EDGES), 0, N_NODES)

    params = {
        "w1": 0.1 * jax.random.normal(keys[3], (N_EXPERTS, F_IN, HID), jnp.float32),
        "b1": 0.1 * jax.random.normal(keys[4], (N_EXPERTS, 1, HID), jnp.float32),
        "w2": 0.1 * jax.random.normal(keys[5], (N_EXPERTS, HID, D_OUT), jnp.float32),
        "b2": 0.1 * jax.random.normal(keys[6], (N_EXPERTS, 1, D_OUT), jnp.float32),
        "wg1": 0.1 * jax.random.normal(keys[7], (F_IN, HID_G), jnp.float32),
        "bg1": 0.1 * jax.random.normal(keys[8], (1, HID_G), jnp.float32),
        "wg2": 0.1 * jax.random.normal(keys[9], (HID_G, N_EXPERTS), jnp.float32),
        "bg2": 0.1 * jax.random.normal(keys[10], (1, N_EXPERTS), jnp.float32),
    }

    packed = pack_moe_params(params)   # one-time lane-dense packing (not per forward call)

    out = moe_forward(atomic_numbers, pos, edge_index, batch, N_GRAPHS, packed)
    out = jax.block_until_ready(out)

    ref = moe_forward_ref(atomic_numbers, pos, edge_index, batch, N_GRAPHS, params)
    assert out.shape == (N_GRAPHS, D_OUT)
    # 1e-4 tolerance: EUP reciprocal (+Newton step) in the softmax and matmul-ordered
    # pooling differ from the pure-JAX reference by a few f32 ulps only.
    assert jnp.allclose(out, ref, atol=1e-4, rtol=1e-4), (out, ref)

    print("KERNEL_OK")
</pallas_src>

<mosaic_0001>
module attributes {stable_mosaic.version = 11 : i64} {
  func.func @moe_fused_kernel(%arg0: i32, %arg1: memref<1x16xi32, #tpu.memory_space<vmem>>, %arg2: memref<16x1xf32, #tpu.memory_space<vmem>>, %arg3: memref<16x3xf32, #tpu.memory_space<vmem>>, %arg4: memref<5x144xf32, #tpu.memory_space<vmem>>, %arg5: memref<144x48xf32, #tpu.memory_space<vmem>>, %arg6: memref<64x48xf32, #tpu.memory_space<vmem>>, %arg7: memref<2x8xf32, #tpu.memory_space<vmem>>, %arg8: memref<2x48xf32, #tpu.memory_space<vmem>>, %arg9: memref<2x1xf32, #tpu.memory_space<vmem>>) attributes {dimension_semantics = [#tpu.dimension_semantics<arbitrary>], iteration_bounds = array<i64: 1>, scalar_prefetch = 0 : i64, scratch_operands = 2 : i64, tpu.core_type = #tpu.core_type<tc>, window_params = [{transform_indices = @transform_0, window_bounds = array<i64: 1, 16>}, {transform_indices = @transform_1, window_bounds = array<i64: 16, 1>}, {transform_indices = @transform_2, window_bounds = array<i64: 16, 3>}, {pipeline_mode = #tpu.pipeline_mode<synchronous>, transform_indices = @transform_3, window_bounds = array<i64: 5, 144>}, {pipeline_mode = #tpu.pipeline_mode<synchronous>, transform_indices = @transform_4, window_bounds = array<i64: 144, 48>}, {pipeline_mode = #tpu.pipeline_mode<synchronous>, transform_indices = @transform_5, window_bounds = array<i64: 64, 48>}, {pipeline_mode = #tpu.pipeline_mode<synchronous>, transform_indices = @transform_6, window_bounds = array<i64: 2, 8>}]} {
    %c0_i32 = arith.constant 0 : i32
    %0 = arith.cmpi eq, %arg0, %c0_i32 : i32
    %1 = arith.extui %0 : i1 to i32
    %c0_i32_0 = arith.constant 0 : i32
    %2 = arith.cmpi ne, %1, %c0_i32_0 : i32
    scf.if %2 {
      %cst_28 = arith.constant 0.000000e+00 : f32
      %40 = vector.broadcast %cst_28 : f32 to vector<2x48xf32>
      %c0_29 = arith.constant 0 : index
      %c0_30 = arith.constant 0 : index
      %41 = vector.load %arg8[%c0_29, %c0_30] : memref<2x48xf32, #tpu.memory_space<vmem>>, vector<2x48xf32>
      tpu.vector_store %arg8[%c0_29, %c0_30], %40 {strides = array<i32>} : memref<2x48xf32, #tpu.memory_space<vmem>>, vector<2x48xf32>,
      %cst_31 = arith.constant 0.000000e+00 : f32
      %42 = vector.broadcast %cst_31 : f32 to vector<2x1xf32>
      %c0_32 = arith.constant 0 : index
      %c0_33 = arith.constant 0 : index
      %43 = vector.load %arg9[%c0_32, %c0_33] : memref<2x1xf32, #tpu.memory_space<vmem>>, vector<2x1xf32>
      tpu.vector_store %arg9[%c0_32, %c0_33], %42 {strides = array<i32>} : memref<2x1xf32, #tpu.memory_space<vmem>>, vector<2x1xf32>,
    } else {
    }
    %c0 = arith.constant 0 : index
    %c0_1 = arith.constant 0 : index
    %3 = vector.load %arg2[%c0, %c0_1] : memref<16x1xf32, #tpu.memory_space<vmem>>, vector<16x1xf32>
    %c0_2 = arith.constant 0 : index
    %c0_3 = arith.constant 0 : index
    %4 = vector.load %arg3[%c0_2, %c0_3] : memref<16x3xf32, #tpu.memory_space<vmem>>, vector<16x3xf32>
    %c0_4 = arith.constant 0 : index
    %c0_5 = arith.constant 0 : index
    %5 = vector.load %arg1[%c0_4, %c0_5] : memref<1x16xi32, #tpu.memory_space<vmem>>, vector<1x16xi32>
    %6 = tpu.iota {dimensions = array<i32: 0>} : vector<2x16xi32>
    %7 = vector.broadcast %5 : vector<1x16xi32> to vector<2x16xi32>
    %8 = arith.cmpi eq, %7, %6 : vector<2x16xi32>
    %9 = arith.extui %8 : vector<2x16xi1> to vector<2x16xi32>
    %10 = arith.sitofp %9 : vector<2x16xi32> to vector<2x16xf32>
    %c0_6 = arith.constant 0 : index
    %c0_7 = arith.constant 0 : index
    %11 = vector.load %arg4[%c0_6, %c0_7] : memref<5x144xf32, #tpu.memory_space<vmem>>, vector<1x144xf32>
    %c1 = arith.constant 1 : index
    %c0_8 = arith.constant 0 : index
    %12 = vector.load %arg4[%c1, %c0_8] : memref<5x144xf32, #tpu.memory_space<vmem>>, vector<3x144xf32>
    %c4 = arith.constant 4 : index
    %c0_9 = arith.constant 0 : index
    %13 = vector.load %arg4[%c4, %c0_9] : memref<5x144xf32, #tpu.memory_space<vmem>>, vector<1x144xf32>
    %cst = arith.constant dense<0.000000e+00> : vector<16x144xf32>
    %14 = tpu.matmul %4, %12, %cst {dimension_numbers = #tpu.dot_dimension_numbers<[1], [0], [0], [1], [0, 0, 1, 1], [], []>} : vector<16x3xf32>, vector<3x144xf32>, vector<16x144xf32> -> vector<16x144xf32>
    %15 = vector.broadcast %3 : vector<16x1xf32> to vector<16x144xf32>
    %16 = vector.broadcast %11 : vector<1x144xf32> to vector<16x144xf32>
    %17 = arith.mulf %15, %16 : vector<16x144xf32>
    %18 = arith.addf %14, %17 : vector<16x144xf32>
    %19 = vector.broadcast %13 : vector<1x144xf32> to vector<16x144xf32>
    %20 = arith.addf %18, %19 : vector<16x144xf32>
    %cst_10 = arith.constant 0.000000e+00 : f32
    %21 = vector.broadcast %cst_10 : f32 to vector<16x144xf32>
    %22 = arith.maximumf %20, %21 : vector<16x144xf32>
    %c0_11 = arith.constant 0 : index
    %c0_12 = arith.constant 0 : index
    %23 = vector.load %arg6[%c0_11, %c0_12] : memref<64x48xf32, #tpu.memory_space<vmem>>, vector<1x48xf32>
    %c0_13 = arith.constant 0 : index
    %c0_14 = arith.constant 0 : index
    %24 = vector.load %arg5[%c0_13, %c0_14] : memref<144x48xf32, #tpu.memory_space<vmem>>, vector<144x48xf32>
    %cst_15 = arith.constant dense<0.000000e+00> : vector<16x48xf32>
    %25 = tpu.matmul %22, %24, %cst_15 {dimension_numbers = #tpu.dot_dimension_numbers<[1], [0], [0], [1], [0, 0, 1, 1], [], []>} : vector<16x144xf32>, vector<144x48xf32>, vector<16x48xf32> -> vector<16x48xf32>
    %26 = vector.broadcast %23 : vector<1x48xf32> to vector<16x48xf32>
    %27 = arith.addf %25, %26 : vector<16x48xf32>
    %c0_16 = arith.constant 0 : index
    %c0_17 = arith.constant 0 : index
    %28 = vector.load %arg8[%c0_16, %c0_17] : memref<2x48xf32, #tpu.memory_space<vmem>>, vector<2x48xf32>
    %cst_18 = arith.constant dense<0.000000e+00> : vector<2x48xf32>
    %29 = tpu.matmul %10, %27, %cst_18 {dimension_numbers = #tpu.dot_dimension_numbers<[1], [0], [0], [1], [0, 0, 1, 1], [], []>} : vector<2x16xf32>, vector<16x48xf32>, vector<2x48xf32> -> vector<2x48xf32>
    %30 = arith.addf %28, %29 : vector<2x48xf32>
    %c0_19 = arith.constant 0 : index
    %c0_20 = arith.constant 0 : index
    %31 = vector.load %arg8[%c0_19, %c0_20] : memref<2x48xf32, #tpu.memory_space<vmem>>, vector<2x48xf32>
    tpu.vector_store %arg8[%c0_19, %c0_20], %30 {strides = array<i32>} : memref<2x48xf32, #tpu.memory_space<vmem>>, vector<2x48xf32>,
    %c0_21 = arith.constant 0 : index
    %c0_22 = arith.constant 0 : index
    %32 = vector.load %arg9[%c0_21, %c0_22] : memref<2x1xf32, #tpu.memory_space<vmem>>, vector<2x1xf32>
    %cst_23 = arith.constant dense<0.000000e+00> : vector<2xf32>
    %33 = vector.multi_reduction <add>, %10, %cst_23 [1] : vector<2x16xf32> to vector<2xf32>
    %34 = vector.shape_cast %33 : vector<2xf32> to vector<2x1xf32>
    %35 = arith.addf %32, %34 : vector<2x1xf32>
    %c0_24 = arith.constant 0 : index
    %c0_25 = arith.constant 0 : index
    %36 = vector.load %arg9[%c0_24, %c0_25] : memref<2x1xf32, #tpu.memory_space<vmem>>, vector<2x1xf32>
    tpu.vector_store %arg9[%c0_24, %c0_25], %35 {strides = array<i32>} : memref<2x1xf32, #tpu.memory_space<vmem>>, vector<2x1xf32>,
    %c0_i32_26 = arith.constant 0 : i32
    %37 = arith.cmpi eq, %arg0, %c0_i32_26 : i32
    %38 = arith.extui %37 : i1 to i32
    %c0_i32_27 = arith.constant 0 : i32
    %39 = arith.cmpi ne, %38, %c0_i32_27 : i32
    scf.if %39 {
      %c0_28 = arith.constant 0 : index
      %c0_29 = arith.constant 0 : index
      %40 = vector.load %arg8[%c0_28, %c0_29] : memref<2x48xf32, #tpu.memory_space<vmem>>, vector<2x48xf32>
      %c0_30 = arith.constant 0 : index
      %c0_31 = arith.constant 0 : index
      %41 = vector.load %arg9[%c0_30, %c0_31] : memref<2x1xf32, #tpu.memory_space<vmem>>, vector<2x1xf32>
      %cst_32 = arith.constant 1.000000e+00 : f32
      %42 = vector.broadcast %cst_32 : f32 to vector<2x1xf32>
      %43 = arith.maximumf %41, %42 : vector<2x1xf32>
      %44 = tpu.reciprocal %43 : vector<2x1xf32> -> vector<2x1xf32>
      %45 = vector.extract_strided_slice %40 {offsets = [0, 0], sizes = [2, 32], strides = [1, 1]} : vector<2x48xf32> to vector<2x32xf32>
      %46 = vector.extract_strided_slice %40 {offsets = [0, 32], sizes = [2, 16], strides = [1, 1]} : vector<2x48xf32> to vector<2x16xf32>
      %47 = vector.broadcast %44 : vector<2x1xf32> to vector<2x16xf32>
      %48 = arith.mulf %46, %47 : vector<2x16xf32>
      %c8 = arith.constant 8 : index
      %c0_33 = arith.constant 0 : index
      %49 = vector.load %arg6[%c8, %c0_33] : memref<64x48xf32, #tpu.memory_space<vmem>>, vector<16x4xf32>
      %c1_34 = arith.constant 1 : index
      %c0_35 = arith.constant 0 : index
      %50 = vector.load %arg6[%c1_34, %c0_35] : memref<64x48xf32, #tpu.memory_space<vmem>>, vector<1x4xf32>
      %cst_36 = arith.constant dense<0.000000e+00> : vector<2x4xf32>
      %51 = tpu.matmul %48, %49, %cst_36 {dimension_numbers = #tpu.dot_dimension_numbers<[1], [0], [0], [1], [0, 0, 1, 1], [], []>} : vector<2x16xf32>, vector<16x4xf32>, vector<2x4xf32> -> vector<2x4xf32>
      %52 = vector.broadcast %50 : vector<1x4xf32> to vector<2x4xf32>
      %53 = arith.addf %51, %52 : vector<2x4xf32>
      %cst_37 = arith.constant dense<0xFF800000> : vector<2xf32>
      %54 = vector.multi_reduction <maximumf>, %53, %cst_37 [1] : vector<2x4xf32> to vector<2xf32>
      %55 = vector.shape_cast %54 : vector<2xf32> to vector<2x1xf32>
      %56 = vector.broadcast %55 : vector<2x1xf32> to vector<2x4xf32>
      %57 = arith.subf %53, %56 : vector<2x4xf32>
      %58 = math.exp %57 : vector<2x4xf32>
      %cst_38 = arith.constant dense<0.000000e+00> : vector<2xf32>
      %59 = vector.multi_reduction <add>, %58, %cst_38 [1] : vector<2x4xf32> to vector<2xf32>
      %60 = vector.shape_cast %59 : vector<2xf32> to vector<2x1xf32>
      %61 = tpu.reciprocal %60 {approx = true} : vector<2x1xf32> -> vector<2x1xf32>
      %62 = arith.mulf %60, %61 : vector<2x1xf32>
      %cst_39 = arith.constant 2.000000e+00 : f32
      %63 = vector.broadcast %cst_39 : f32 to vector<2x1xf32>
      %64 = arith.subf %63, %62 : vector<2x1xf32>
      %65 = arith.mulf %61, %64 : vector<2x1xf32>
      %66 = vector.broadcast %65 : vector<2x1xf32> to vector<2x4xf32>
      %67 = arith.mulf %58, %66 : vector<2x4xf32>
      %c24 = arith.constant 24 : index
      %c0_40 = arith.constant 0 : index
      %68 = vector.load %arg6[%c24, %c0_40] : memref<64x48xf32, #tpu.memory_space<vmem>>, vector<4x32xf32>
      %c32 = arith.constant 32 : index
      %c0_41 = arith.constant 0 : index
      %69 = vector.load %arg6[%c32, %c0_41] : memref<64x48xf32, #tpu.memory_space<vmem>>, vector<32x8xf32>
      %cst_42 = arith.constant dense<0.000000e+00> : vector<2x32xf32>
      %70 = tpu.matmul %67, %68, %cst_42 {dimension_numbers = #tpu.dot_dimension_numbers<[1], [0], [0], [1], [0, 0, 1, 1], [], []>} : vector<2x4xf32>, vector<4x32xf32>, vector<2x32xf32> -> vector<2x32xf32>
      %71 = arith.mulf %45, %70 : vector<2x32xf32>
      %cst_43 = arith.constant dense<0.000000e+00> : vector<2x8xf32>
      %72 = tpu.matmul %71, %69, %cst_43 {dimension_numbers = #tpu.dot_dimension_numbers<[1], [0], [0], [1], [0, 0, 1, 1], [], []>} : vector<2x32xf32>, vector<32x8xf32>, vector<2x8xf32> -> vector<2x8xf32>
      %c0_44 = arith.constant 0 : index
      %c0_45 = arith.constant 0 : index
      %73 = vector.load %arg7[%c0_44, %c0_45] : memref<2x8xf32, #tpu.memory_space<vmem>>, vector<2x8xf32>
      tpu.vector_store %arg7[%c0_44, %c0_45], %72 {strides = array<i32>} : memref<2x8xf32, #tpu.memory_space<vmem>>, vector<2x8xf32>,
    } else {
    }
    return
  }
  func.func @transform_0(%arg0: i32) -> (i32, i32) {
    %c0_i32 = arith.constant 0 : i32
    %c0_i32_0 = arith.constant 0 : i32
    return %c0_i32, %arg0 : i32, i32
  }
  func.func @transform_1(%arg0: i32) -> (i32, i32) {
    %c0_i32 = arith.constant 0 : i32
    %c0_i32_0 = arith.constant 0 : i32
    return %arg0, %c0_i32 : i32, i32
  }
  func.func @transform_2(%arg0: i32) -> (i32, i32) {
    %c0_i32 = arith.constant 0 : i32
    %c0_i32_0 = arith.constant 0 : i32
    return %arg0, %c0_i32 : i32, i32
  }
  func.func @transform_3(%arg0: i32) -> (i32, i32) {
    %c0_i32 = arith.constant 0 : i32
    %c0_i32_0 = arith.constant 0 : i32
    %c0_i32_1 = arith.constant 0 : i32
    return %c0_i32, %c0_i32_0 : i32, i32
  }
  func.func @transform_4(%arg0: i32) -> (i32, i32) {
    %c0_i32 = arith.constant 0 : i32
    %c0_i32_0 = arith.constant 0 : i32
    %c0_i32_1 = arith.constant 0 : i32
    return %c0_i32, %c0_i32_0 : i32, i32
  }
  func.func @transform_5(%arg0: i32) -> (i32, i32) {
    %c0_i32 = arith.constant 0 : i32
    %c0_i32_0 = arith.constant 0 : i32
    %c0_i32_1 = arith.constant 0 : i32
    return %c0_i32, %c0_i32_0 : i32, i32
  }
  func.func @transform_6(%arg0: i32) -> (i32, i32) {
    %c0_i32 = arith.constant 0 : i32
    %c0_i32_0 = arith.constant 0 : i32
    %c0_i32_1 = arith.constant 0 : i32
    return %c0_i32, %c0_i32_0 : i32, i32
  }
}

</mosaic_0001>

<bundles_post_ra>
// kernel: moe_forward.1
= control target key start
LH: loop header
LB: loop body
LE: loop exit
PB: predicated region body
PF: predicated region fallthrough
CT: control target
= control target key end

     0   :  { %vm87_vm0 = vcmask 1042432   ;;  %v798_v4 = vmov 0.0   ;;  %vm80_vm1 = vcmask 23552   ;;  %v799_v6 = vmov 0   ;;  %s1000_s0 = inlined_call_operand.vmem [shape: s32[1,16], index: 0, kind: input, shape index: {}]   ;;  %s1001_s1 = inlined_call_operand.vmem [shape: f32[16,1], index: 1, kind: input, shape index: {}]   ;;  %s1002_s2 = inlined_call_operand.vmem [shape: f32[16,3], index: 2, kind: input, shape index: {}]   ;;  %s1003_s3 = inlined_call_operand.vmem [shape: f32[5,144], index: 3, kind: input, shape index: {}]   ;;  %s1004_s4 = inlined_call_operand.vmem [shape: f32[144,48], index: 4, kind: input, shape index: {}]   ;;  %s1005_s5 = inlined_call_operand.vmem [shape: f32[64,48], index: 5, kind: input, shape index: {}]   ;;  %s1006_s6 = inlined_call_operand.hbm [shape: f32[2,8], index: 6, kind: output, shape index: {}]  }
   0x1   :  { %v48_v0 = vld [vmem:[%s1003_s3 + $0x8] sm:$0xe]  ;;  %v47_v1 = vld [vmem:[%s1003_s3] sm:$0xe]  ;;  %156 = vmatprep.mubr.f32.mxu0 %v798_v4  ;;  %766 = vset.pattern.permute.xlu0 %v799_v6  ;;  %v191_v10 = vld [vmem:[%s1004_s4 + $0x10] sm:$0xff]  ;;  %v800_v13 = vmov 0.0|0.0  }
   0x2   :  { %v79_v2 = vrot.slane %v48_v0, 1  ;;  %v78_v3 = vrot.slane %v47_v1, 1  ;;  %v34_v5 = vld [vmem:[%s1002_s2] sm:$0xff]  ;;  %767 = vset.pattern.permute.xlu1 %v799_v6  ;;  %v190_v9 = vld [vmem:[%s1004_s4 + $0x8] sm:$0xff]  ;;  %v192_v11 = vld [vmem:[%s1004_s4 + $0x18] sm:$0xff]  ;;  %721 = vmatprep.subr.bf16.mxu1 %v800_v13 }
   0x3   :  { %v32_v7 = vld [vmem:[%s1001_s1] sm:$0xff]  ;;  %v33_v12 = vld [vmem:[%s1001_s1 + $0x8] sm:$0xff]  ;;  %v725_v16 = vpack.c.bf16 %v192_v11, %v191_v10 }
   0x4   :  { %v189_v8 = vld [vmem:[%s1004_s4] sm:$0xff]  ;;  %665 = vmatprep.subr.msk.mxu0 %vm87_vm0, %v79_v2  ;;  %53 = vperm.xlu0 %766, %v32_v7   ;;  %v35_v15 = vld [vmem:[%s1002_s2 + $0x8] sm:$0xff] }
   0x5   :  { %666 = vmatpush1.msk.msra.mxu0 %vm87_vm0, %v78_v3  ;;  %v722_v14 = vpack.c.bf16 %v190_v9, %v189_v8  ;;  %v193_v17 = vld [vmem:[%s1004_s4 + $0x20] sm:$0xff]  ;;  %v194_v18 = vld [vmem:[%s1004_s4 + $0x28] sm:$0xff] }
   0x6   :  { %667 = vmatmul.mubr.msk.f32.vlgmr.msra.gmra.mrb[0].mxu0 %vm80_vm1, %v34_v5  ;;  %748 = vmatprep.subr.bf16.mxu0 %v800_v13 }
   0x7   :  { %162 = vmatprep.mubr.f32.mxu0 %v798_v4  ;;  %723 = vmatpush1.bf16.msra.mxu1 %v722_v14 }
   0x8   :  { %58 = vperm.xlu0 %766, %v33_v12   ;;  %724 = vmatprep.subr.bf16.mxu1 %v800_v13 }
   0x9   :  { %11 = vsyncpa [#allocation5], 0  ;;  %v728_v19 = vpack.c.bf16 %v194_v18, %v193_v17  ;;  %v195_v20 = vld [vmem:[%s1004_s4 + $0x30] sm:$0xff]  ;;  %v196_v21 = vld [vmem:[%s1004_s4 + $0x38] sm:$0xff]  ;;  %v37_v38 = vlaneseq  ;;  %vm371_vm2 = vcmask 123904   ;;  %vm211_vm4 = vcmask 130048  }
   0xa   :  { %668 = vmatmul.mubr.msk.f32.gmra.mrb[2].mxu0 %vm80_vm1, %v35_v15  ;;  %v731_v22 = vpack.c.bf16 %v196_v21, %v195_v20  ;;  %v197_v23 = vld [vmem:[%s1004_s4 + $0x40] sm:$0xff]  ;;  %v198_v24 = vld [vmem:[%s1004_s4 + $0x48] sm:$0xff]  ;;  %v199_v26 = vld [vmem:[%s1004_s4 + $0x50] sm:$0xff]  ;;  %vm801_vm5 = vmmov 0   ;;  %vm30_vm6 = vcmask 1024   ;;  %vm28_vm7 = vcmask 386048  }
   0xb   :  { %726 = vmatpush1.bf16.msra.mxu1 %v725_v16  ;;  %v734_v25 = vpack.c.bf16 %v198_v24, %v197_v23  ;;  %v200_v27 = vld [vmem:[%s1004_s4 + $0x58] sm:$0xff]  ;;  %v201_v29 = vld [vmem:[%s1004_s4 + $0x60] sm:$0xff]  ;;  %v202_v30 = vld [vmem:[%s1004_s4 + $0x68] sm:$0xff]  ;;  %v38_v39 = vshrl.u32 %v37_v38, 7  ;;  %695 = vmatprep.mubr.msk.f32.mxu0 %vm801_vm5, %v798_v4  ;;  %31 = vst.msk [vmem:[#allocation3] sm:$0x3] %vm30_vm6, %v798_v4 }
   0xc   :  { %727 = vmatprep.subr.bf16.mxu1 %v800_v13  ;;  %v737_v28 = vpack.c.bf16 %v200_v27, %v199_v26  ;;  %v740_v31 = vpack.c.bf16 %v202_v30, %v201_v29  ;;  %v203_v32 = vld [vmem:[%s1004_s4 + $0x70] sm:$0xff]  ;;  %v204_v33 = vld [vmem:[%s1004_s4 + $0x78] sm:$0xff]  ;;  %v205_v35 = vld [vmem:[%s1004_s4 + $0x80] sm:$0xff]  ;;  %29 = vst.msk [vmem:[#allocation2] sm:$0x3] %vm28_vm7, %v798_v4  ;;  %s802_s26 = smov 96  }
   0xd   :  { %v743_v34 = vpack.c.bf16 %v204_v33, %v203_v32  ;;  %v206_v36 = vld [vmem:[%s1004_s4 + $0x88] sm:$0xff]  ;;  %v662_v40 = vld [vmem:[%s1000_s0] ss:$0 sm:$0xff]  ;;  %v64_v43 = vsub.s32 0, %v38_v39  ;;  %v68_v45 = vsub.s32 1, %v38_v39  ;;  %v392_v26 = vld [vmem:[%s1005_s5 + $0x10] sm:$0xff] }
   0xe   :  { %v746_v37 = vpack.c.bf16 %v206_v36, %v205_v35  ;;  %vm43_vm3 = vcmp.eq.s32.totalorder %v662_v40, %v38_v39  ;;  %v46_v44 = vld [vmem:[%s1003_s3] ss:$8 sm:$0x3]  ;;  %v664_v49 = vld [vmem:[%s1003_s3 + $0x4] ss:$8 sm:$0x3] }
   0xf   :  { %729 = vmatpush1.bf16.msra.mxu1 %v728_v19  ;;  %v931_v41 = vsel %vm43_vm3, 1.0, %v798_v4  ;;  %v65_v46 = vrot.slane %v46_v44, %v64_v43  ;;  %v69_v47 = vrot.slane %v46_v44, %v68_v45  ;;  %v173_v52 = vrot.slane %v664_v49, %v64_v43  ;;  %v669_v19 = vld [vmem:[%s1005_s5] ss:$0 sm:$0xff]  ;;  %v673_v36 = vld [vmem:[%s1005_s5 + $0x1] ss:$0 sm:$0xff]  ;;  %s803_s15 = smov [#allocation4]  }
  0x10   :  { %730 = vmatprep.subr.bf16.mxu1 %v800_v13  ;;  %v372_v42 = vsel %vm371_vm2, %v931_v41, 0.0  ;;  %v177_v55 = vrot.slane %v664_v49, %v68_v45  ;;  %vm473_vm8 = vcmask 25600   ;;  %vm497_vm9 = vcmask 1043456   ;;  %s654_s16 = sshll.u32 %s803_s15, 4  ;;  %s655_s16 = int_to_ptr.vmem [resolvable:$true] %s654_s16 }
  0x11   :  { %373 = vadd.xlane.f32.xlu1 %v372_v42  ;;  %vm493_vm10 = vcmask 31744   ;;  %vm572_vm11 = vcmask 261120   ;;  %vm646_vm12 = vcmask 58368   ;;  %s774_s1 = scalar_lea.vmem %s655_s16, 32  ;;  %p779_p1 = scmp.lt.s32.totalorder %s655_s16, %s655_s16 }
  0x12   :  { %v370_v11 = vld [vmem:[#allocation3] sm:$0x3]  ;;  %p775_p0 = scmp.ne.s32.totalorder %s655_s16, %s774_s1  ;;  %p780_p2 = scmp.lt.s32.totalorder %s774_s1, %s774_s1 }
  0x13   :  { %732 = vmatpush1.bf16.msra.mxu1 %v731_v22 }
  0x14   :  { %733 = vmatprep.subr.bf16.mxu1 %v800_v13  ;;  %p781_p3 = por %p780_p2, %p779_p1 }
  0x16   :  { %p782_p4 = pnand %p781_p3, %p775_p0 }
  0x17   :  { %735 = vmatpush1.bf16.msra.mxu1 %v734_v25  ;;  %v391_v25 = vld [vmem:[%s1005_s5 + $0x8] sm:$0xff] }
  0x18   :  { %736 = vmatprep.subr.bf16.mxu1 %v800_v13  ;;  %v752_v27 = vpack.c.bf16 %v392_v26, %v391_v25 }
  0x1b   :  { %738 = vmatpush1.bf16.msra.mxu1 %v737_v28  ;;  %v293_v28 = vld [vmem:[#allocation2] sm:$0x3] }
  0x1c   :  { %739 = vmatprep.subr.bf16.mxu1 %v800_v13 }
  0x1f   :  { %741 = vmatpush1.bf16.msra.mxu1 %v740_v31 }
  0x20   :  { %742 = vmatprep.subr.bf16.mxu1 %v800_v13 }
  0x23   :  { %744 = vmatpush1.bf16.msra.mxu1 %v743_v34 }
  0x24   :  { %745 = vmatprep.subr.bf16.mxu1 %v800_v13 }
  0x27   :  { %747 = vmatpush1.bf16.msra.mxu1 %v746_v37 }
  0x83   :  { %v54_v48 = vpop.permute.xlu0 %53 }
  0x84   :  { %v72_v50 = vmul.f32 %v65_v46, %v54_v48  ;;  %v73_v51 = vmul.f32 %v69_v47, %v54_v48 }
  0x87   :  { %v59_v53 = vpop.permute.xlu0 %58 }
  0x88   :  { %v74_v59 = vmul.f32 %v65_v46, %v59_v53  ;;  %v75_v61 = vmul.f32 %v69_v47, %v59_v53  ;;  %v488_v46 = vld [vmem:[%s1005_s5 + $0x18] sm:$0xf] }
  0x9e   :  { %v374_v10 = vpop.xlane.xlu1 %373 }
  0x9f   :  { %v375_v12 = vadd.f32 %v374_v10, %v370_v11 }
  0xa1   :  { %377 = vst.msk [vmem:[#allocation3] sm:$0x3] %vm30_vm6, %v375_v12 }
  0xa8   :  { %v382_v14 = vld [vmem:[#allocation3] sm:$0x3] }
  0xa9   :  { %v383_v15 = vmax.f32 %v382_v14, 1.0 }
  0xab   :  { %768 = vrcp.f32 %v383_v15 }
  0xb5   :  { %v769_v16 = vpop.eup %768 }
  0xb6   :  { %387 = vperm.xlu1 %767, %v769_v16  }
  0xd9   :  { %v158_v54 = vpop.f32.mrb[0].mxu0 }
  0xda   :  { %v159_v56 = vadd.f32 %v158_v54, %v72_v50  ;;  %v160_v57 = vpop.f32.mrb[1].mxu0 }
  0xdb   :  { %v161_v58 = vadd.f32 %v160_v57, %v73_v51  ;;  %v489_v51 = vld [vmem:[%s1005_s5 + $0x20] sm:$0xff]  ;;  %v492_v57 = vld [vmem:[%s1005_s5 + $0x38] sm:$0xff] }
  0xdc   :  { %v180_v60 = vadd.f32 %v173_v52, %v159_v56  ;;  %v491_v56 = vld [vmem:[%s1005_s5 + $0x30] sm:$0xff] }
  0xdd   :  { %v164_v62 = vpop.f32.mrb[2].mxu0  ;;  %v181_v63 = vadd.f32 %v177_v55, %v161_v58  ;;  %v758_v58 = vpack.c.bf16 %v492_v57, %v491_v56 }
  0xde   :  { %v165_v0 = vadd.f32 %v164_v62, %v74_v59  ;;  %v166_v1 = vpop.f32.mrb[3].mxu0  ;;  %v184_v5 = vmax.f32 %v180_v60, 0.0 }
  0xdf   :  { %v167_v2 = vadd.f32 %v166_v1, %v75_v61  ;;  %v185_v3 = vmax.f32 %v181_v63, 0.0 }
  0xe0   :  { %v182_v6 = vadd.f32 %v173_v52, %v165_v0  ;;  %v490_v52 = vld [vmem:[%s1005_s5 + $0x28] sm:$0xff] }
  0xe1   :  { %v183_v7 = vadd.f32 %v177_v55, %v167_v2  ;;  %670 = vmatprep.mubr.msk.f32.mxu1 %vm211_vm4, %v185_v3  ;;  %v755_v54 = vpack.c.bf16 %v490_v52, %v489_v51 }
  0xe2   :  { %283 = vmatmul.mubr.f32.vlgmr.msra.gmra.mrb[0].mxu1 %v184_v5  ;;  %v186_v9 = vmax.f32 %v182_v6, 0.0 }
  0xe3   :  { %v187_v8 = vmax.f32 %v183_v7, 0.0 }
  0xe5   :  { %671 = vmatprep.mubr.msk.f32.mxu1 %vm211_vm4, %v187_v8 }
  0xe6   :  { %288 = vmatmul.mubr.f32.gmra.mrb[2].mxu1 %v186_v9 }
 0x135   :  { %v388_v32 = vpop.permute.xlu1 %387 }
 0x1b5   :  { %v284_v17 = vpop.f32.mrb[0].mxu1 }
 0x1b6   :  { %v286_v18 = vpop.f32.mrb[1].mxu1  ;;  %v285_v21 = vadd.f32 %v669_v19, %v284_v17 }
 0x1b9   :  { %v289_v20 = vpop.f32.mrb[2].mxu1 }
 0x1ba   :  { %v290_v22 = vadd.f32 %v669_v19, %v289_v20  ;;  %v291_v23 = vpop.f32.mrb[3].mxu1 }
 0x1bc   :  { %v749_v24 = vpack.c.bf16 %v290_v22, %v285_v21 }
 0x1be   :  { %750 = vmatpush3.bf16.msra.mxu0 %v749_v24 }
 0x1bf   :  { %751 = vmatprep.subr.bf16.mxu0 %v800_v13 }
 0x1c1   :  { %696 = vmatmul.mubr.msk.f32.vlgmr.msra.gmra.mrb[4].mxu0 %vm211_vm4, %v931_v41 }
 0x1c2   :  { %702 = vmatprep.mubr.msk.f32.mxu0 %vm801_vm5, %v798_v4  ;;  %753 = vmatpush3.bf16.msra.mxu0 %v752_v27 }
 0x1c3   :  { %705 = vmatprep.subr.mxu0 %v798_v4 }
 0x294   :  { %v363_v29 = vpop.f32.mrb[4].mxu0 }
 0x295   :  { %v367_v30 = vadd.f32 %v363_v29, %v293_v28  ;;  %v697_v31 = vpop.f32.mrb[5].mxu0 }
 0x297   :  { %369 = vst.msk [vmem:[#allocation2] sm:$0x3] %vm28_vm7, %v367_v30 }
 0x29e   :  { %v381_v33 = vld [vmem:[#allocation2] sm:$0x3] }
 0x29f   :  { %v390_v34 = vmul.f32 %v388_v32, %v381_v33 }
 0x2a1   :  { %399 = vrot.lane.b32.xlu0 %v390_v34, %s802_s26 }
 0x313   :  { %v400_v35 = vpop.permute.xlu0 %399 }
 0x314   :  { %703 = vmatmul.mubr.msk.f32.vlgmr.msra.gmra.mrb[6].mxu0 %vm211_vm4, %v400_v35 }
 0x315   :  { %707 = vmatprep.mubr.msk.f32.mxu0 %vm801_vm5, %v798_v4  ;;  %706 = vmatpush3.msk.msra.mxu0 %vm497_vm9, %v488_v46 }
 0x316   :  { %754 = vmatprep.subr.bf16.mxu0 %v800_v13 }
 0x3e7   :  { %v469_v37 = vpop.f32.mrb[6].mxu0 }
 0x3e8   :  { %v470_v38 = vadd.f32 %v673_v36, %v469_v37  ;;  %v704_v39 = vpop.f32.mrb[7].mxu0 }
 0x3ea   :  { %v474_v40 = vsel %vm473_vm8, %v470_v38, -inf }
 0x3eb   :  { %475 = vmax.xlane.f32.xlu0 %v474_v40 }
 0x478   :  { %v476_v41 = vpop.xlane.xlu0 %475 }
 0x479   :  { %v477_v42 = vsub.f32 %v470_v38, %v476_v41 }
 0x47b   :  { %v478_v43 = vmul.f32 1.442695, %v477_v42 }
 0x47d   :  { %770 = vpow2.f32 %v478_v43 }
 0x487   :  { %v771_v44 = vpop.eup %770 }
 0x488   :  { %v480_v45 = vsel %vm473_vm8, %v771_v44, 0.0 }
 0x489   :  { %481 = vadd.xlane.f32.xlu1 %v480_v45 }
 0x516   :  { %v482_v47 = vpop.xlane.xlu1 %481 }
 0x517   :  { %772 = vrcp.f32 %v482_v47 }
 0x521   :  { %v773_v48 = vpop.eup %772 }
 0x522   :  { %v484_v49 = vmul.f32 %v773_v48, %v482_v47 }
 0x524   :  { %v485_v50 = vsub.f32 2.0, %v484_v49 }
 0x526   :  { %v486_v53 = vmul.f32 %v773_v48, %v485_v50 }
 0x528   :  { %v487_v55 = vmul.f32 %v771_v44, %v486_v53 }
 0x52a   :  { %708 = vmatmul.mubr.msk.f32.vlgmr.msra.gmra.mrb[8].mxu0 %vm493_vm10, %v487_v55 }
 0x52b   :  { %756 = vmatpush3.bf16.msra.mxu0 %v755_v54  ;;  %718 = vmatprep.mubr.msk.f32.mxu0 %vm801_vm5, %v798_v4 }
 0x52c   :  { %757 = vmatprep.subr.bf16.mxu0 %v800_v13 }
 0x52f   :  { %759 = vmatpush3.bf16.msra.mxu0 %v758_v58 }
 0x5fd   :  { %v567_v59 = vpop.f32.mrb[8].mxu0 }
 0x5fe   :  { %v571_v60 = vmul.f32 %v567_v59, %v381_v33  ;;  %v709_v61 = vpop.f32.mrb[9].mxu0 }
 0x600   :  { %719 = vmatmul.mubr.msk.f32.vlgmr.msra.gmra.mrb[10].mxu0 %vm572_vm11, %v571_v60 }
 0x6d3   :  { %v642_v4 = vpop.f32.mrb[10].mxu0 }
 0x6d4   :  { %647 = vst.msk [vmem:[#allocation4] sm:$0x3] %vm646_vm12, %v642_v4  ;;  %v720_v13 = vpop.f32.mrb[11].mxu0 }
 0x6d5   :  { %785 = shalt.err (!%p782_p4)
}
 0x6d6   :  { %s786_s18 = scalar_lea.hbm %s1006_s6, 32 }
 0x6d7   :  { %p787_p5 = scmp.ne.s32.totalorder %s1006_s6, %s786_s18  ;;  %p790_p6 = scmp.lt.u32.totalorder %s786_s18, %s1006_s6 }
 0x6d9   :  { %p792_p7 = pnand %p790_p6, %p787_p5 }
 0x6db   :  { %795 = shalt.err (!%p792_p7)
}
 0x6dc   :  { %657 = dma.vmem_to_hbm [thread:$0]  %s655_s16, 32, %s1006_s6, [#allocation5]  }
 0x6dd   :  { %796 = dma.done.wait [#allocation5], 32  }
 0x6de   :  { %797 = vsyncadd [#allocation5], 4294967264 }
 0x6df   :  { %661 = vsyncpa [#allocation5], 1 }

</bundles_post_ra>
